<compile_context>
chip_gen: v7x
topology: tpu7x:2x2x1
jax: 0.10.0
libtpu: 0.0.40
codegen_flags: <defaults>
</compile_context>

<pallas_src>
import math

import jax
import jax.numpy as jnp
from jax.experimental import pallas as pl
from jax.experimental.pallas import tpu as pltpu

NC_PAD = 128  # logits padded to a full lane width -> dense vst (sliced in wrapper)


def _round_up(v, m):
    return ((v + m - 1) // m) * m


def _l2_normalize(h):
    # F.normalize(h, p=2, dim=1, eps=1e-7): clamp the *squared* norm at eps^2
    # (sqrt is monotonic -> equivalent) and use a single rsqrt instead of sqrt+div.
    ss = jnp.sum(h * h, axis=1, keepdims=True)
    return h * jax.lax.rsqrt(jnp.maximum(ss, 1e-14))


def logits_kernel(x_ref, w1_ref, b1_ref, wn_ref, out_ref):
    # classifier_head (num_layers_cls=1 -> single nn.Linear): h = x @ W1.T + b1
    # x cast to bf16 in-register; bf16 operands, f32 accumulation on the MXU.
    xb = x_ref[...].astype(jnp.bfloat16)
    h = jax.lax.dot_general(
        xb, w1_ref[...], (((1,), (1,)), ((), ())),
        preferred_element_type=jnp.float32,
    ) + b1_ref[...]
    h = _l2_normalize(h)

    # classifier_final: weight-normalized Linear; W precomputed, zero-padded to
    # NC_PAD rows, bf16 (single-pass MXU). Store logits as bf16 (lane-dense).
    out_ref[...] = jax.lax.dot_general(
        h.astype(jnp.bfloat16), wn_ref[...], (((1,), (1,)), ((), ())),
        preferred_element_type=jnp.float32,
    ).astype(out_ref.dtype)


def embed_kernel(x_ref, w1_ref, b1_ref, emb_ref):
    # return_embds=True path: classifier_head only (no final layer, no logits I/O).
    xb = x_ref[...].astype(jnp.bfloat16)
    h = jax.lax.dot_general(
        xb, w1_ref[...], (((1,), (1,)), ((), ())),
        preferred_element_type=jnp.float32,
    ) + b1_ref[...]
    emb_ref[...] = _l2_normalize(h)


def prepare_head_params(w1, b1, v, g, nc_pad=NC_PAD):
    """One-time parameter prep: bf16 W1, f32 bias, precomputed+padded+bf16 weight-norm."""
    # weight_norm(dim=0): W = g * V / ||V||_row  — computed once, not per call.
    wn = g * v / jnp.linalg.norm(v, axis=1, keepdims=True)
    nc, dim = wn.shape
    wn_pad = jnp.zeros((nc_pad, dim), jnp.bfloat16).at[:nc, :].set(
        wn.astype(jnp.bfloat16))
    return w1.astype(jnp.bfloat16), b1.reshape(1, -1).astype(jnp.float32), wn_pad


def _pick_tile(B, tile_b):
    # Big row tiles (512-1024) for DMA efficiency, but guarantee >= 2 grid steps
    # when the batch allows it so the "parallel" axis shards across v7x's 2 TCs.
    tile = min(tile_b, _round_up(B, 8))
    if B > 8:
        tile = min(tile, _round_up(pl.cdiv(B, 2), 8))
    return tile


def model_head_forward(x, w1_bf16, b1, wn_pad, num_classes, *,
                       return_embds=False, tile_b=1024):
    """Fused classifier_head (+ classifier_final). Matches Model.forward on features."""
    B, backbone_dim = x.shape
    dim = w1_bf16.shape[0]
    nc_pad = wn_pad.shape[0]

    tile = _pick_tile(B, tile_b)
    b_pad = pl.cdiv(B, tile) * tile
    if b_pad != B:
        # pad only the ragged tail; no pad/cast materialization in the common case
        x = jnp.pad(x, ((0, b_pad - B), (0, 0)))

    grid = (b_pad // tile,)
    x_bytes = b_pad * backbone_dim * x.dtype.itemsize

    if return_embds:
        flops = 2 * b_pad * backbone_dim * dim
        bytes_accessed = x_bytes + w1_bf16.size * 2 + b1.size * 4 + b_pad * dim * 4
        emb = pl.pallas_call(
            embed_kernel,
            out_shape=jax.ShapeDtypeStruct((b_pad, dim), jnp.float32),
            grid=grid,
            in_specs=[
                pl.BlockSpec((tile, backbone_dim), lambda i: (i, 0)),  # x: row-tiled
                pl.BlockSpec((dim, backbone_dim), lambda i: (0, 0)),   # W1: resident
                pl.BlockSpec((1, dim), lambda i: (0, 0)),              # b1: resident
            ],
            out_specs=pl.BlockSpec((tile, dim), lambda i: (i, 0)),
            compiler_params=pltpu.CompilerParams(
                dimension_semantics=("parallel",)),
            cost_estimate=pl.CostEstimate(
                flops=flops, transcendentals=b_pad, bytes_accessed=bytes_accessed),
        )(x, w1_bf16, b1)
        return emb[:B]

    flops = 2 * b_pad * backbone_dim * dim + 2 * b_pad * dim * nc_pad
    bytes_accessed = (x_bytes + w1_bf16.size * 2 + b1.size * 4 + wn_pad.size * 2
                      + b_pad * nc_pad * 2)
    out = pl.pallas_call(
        logits_kernel,
        out_shape=jax.ShapeDtypeStruct((b_pad, nc_pad), jnp.bfloat16),
        grid=grid,
        in_specs=[
            pl.BlockSpec((tile, backbone_dim), lambda i: (i, 0)),      # x: row-tiled
            pl.BlockSpec((dim, backbone_dim), lambda i: (0, 0)),       # W1: resident
            pl.BlockSpec((1, dim), lambda i: (0, 0)),                  # b1: resident
            pl.BlockSpec((nc_pad, dim), lambda i: (0, 0)),             # Wn: resident
        ],
        out_specs=pl.BlockSpec((tile, nc_pad), lambda i: (i, 0)),
        compiler_params=pltpu.CompilerParams(
            dimension_semantics=("parallel",)),
        cost_estimate=pl.CostEstimate(
            flops=flops, transcendentals=b_pad, bytes_accessed=bytes_accessed),
    )(x, w1_bf16, b1, wn_pad)
    return out[:B, :num_classes].astype(jnp.float32)


if __name__ == "__main__":
    B, backbone_dim, dim, num_classes = 8, 512, 128, 5

    key = jax.random.PRNGKey(0)
    kx, kw1, kv = jax.random.split(key, 3)

    # Deterministic synthetic parameters (shapes from Model.__init__):
    #   classifier_head:  Linear(512 -> 128), trunc_normal(std=0.02), bias=0
    #   classifier_final: weight_norm(Linear(128 -> 5, bias=False)), weight_g = 1
    x = jax.random.normal(kx, (B, backbone_dim), dtype=jnp.float32)  # backbone features
    w1 = jax.random.truncated_normal(
        kw1, -2.0, 2.0, (dim, backbone_dim), dtype=jnp.float32) * 0.02
    b1 = jnp.zeros((dim,), dtype=jnp.float32)
    bound = 1.0 / math.sqrt(dim)
    v = jax.random.uniform(kv, (num_classes, dim), jnp.float32, -bound, bound)
    g = jnp.ones((num_classes, 1), dtype=jnp.float32)

    w1_p, b1_p, wn_p = prepare_head_params(w1, b1, v, g)

    out = model_head_forward(x, w1_p, b1_p, wn_p, num_classes)  # return_embds=False (hot path)
    emb = model_head_forward(x, w1_p, b1_p, wn_p, num_classes, return_embds=True)
    jax.block_until_ready((out, emb))

    # pure-JAX f32 reference
    h_ref = x @ w1.T + b1
    h_ref = h_ref / jnp.maximum(jnp.linalg.norm(h_ref, axis=1, keepdims=True), 1e-7)
    wn_ref = g * v / jnp.linalg.norm(v, axis=1, keepdims=True)
    out_ref = h_ref @ wn_ref.T
    # tolerances loosened: x/W1/Wn go through the MXU in bf16 (f32 accumulation),
    # and the logits writeback is bf16.
    assert jnp.allclose(emb, h_ref, atol=2e-2), "embedding mismatch"
    assert jnp.allclose(out, out_ref, atol=3e-2), "logits mismatch"

    print("KERNEL_OK")
</pallas_src>

<mosaic_0001>
module attributes {stable_mosaic.version = 11 : i64} {
  func.func @logits_kernel(%arg0: i32, %arg1: memref<8x512xf32, #tpu.memory_space<vmem>>, %arg2: memref<128x512xbf16, #tpu.memory_space<vmem>>, %arg3: memref<1x128xf32, #tpu.memory_space<vmem>>, %arg4: memref<128x128xbf16, #tpu.memory_space<vmem>>, %arg5: memref<8x128xbf16, #tpu.memory_space<vmem>>) attributes {dimension_semantics = [#tpu.dimension_semantics<parallel>], iteration_bounds = array<i64: 1>, scalar_prefetch = 0 : i64, scratch_operands = 0 : i64, tpu.core_type = #tpu.core_type<tc>, window_params = [{transform_indices = @transform_0, window_bounds = array<i64: 8, 512>}, {pipeline_mode = #tpu.pipeline_mode<synchronous>, transform_indices = @transform_1, window_bounds = array<i64: 128, 512>}, {pipeline_mode = #tpu.pipeline_mode<synchronous>, transform_indices = @transform_2, window_bounds = array<i64: 1, 128>}, {pipeline_mode = #tpu.pipeline_mode<synchronous>, transform_indices = @transform_3, window_bounds = array<i64: 128, 128>}, {transform_indices = @transform_4, window_bounds = array<i64: 8, 128>}]} {
    %c0 = arith.constant 0 : index
    %c0_0 = arith.constant 0 : index
    %0 = vector.load %arg1[%c0, %c0_0] : memref<8x512xf32, #tpu.memory_space<vmem>>, vector<8x512xf32>
    %1 = arith.truncf %0 : vector<8x512xf32> to vector<8x512xbf16>
    %c0_1 = arith.constant 0 : index
    %c0_2 = arith.constant 0 : index
    %2 = vector.load %arg2[%c0_1, %c0_2] : memref<128x512xbf16, #tpu.memory_space<vmem>>, vector<128x512xbf16>
    %cst = arith.constant dense<0.000000e+00> : vector<8x128xf32>
    %3 = tpu.matmul %1, %2, %cst {dimension_numbers = #tpu.dot_dimension_numbers<[1], [1], [0], [0], [0, 0, 1, 0], [], []>} : vector<8x512xbf16>, vector<128x512xbf16>, vector<8x128xf32> -> vector<8x128xf32>
    %c0_3 = arith.constant 0 : index
    %c0_4 = arith.constant 0 : index
    %4 = vector.load %arg3[%c0_3, %c0_4] : memref<1x128xf32, #tpu.memory_space<vmem>>, vector<1x128xf32>
    %5 = vector.broadcast %4 : vector<1x128xf32> to vector<8x128xf32>
    %6 = arith.addf %3, %5 : vector<8x128xf32>
    %7 = arith.mulf %6, %6 : vector<8x128xf32>
    %cst_5 = arith.constant dense<0.000000e+00> : vector<8xf32>
    %8 = vector.multi_reduction <add>, %7, %cst_5 [1] : vector<8x128xf32> to vector<8xf32>
    %9 = vector.shape_cast %8 : vector<8xf32> to vector<8x1xf32>
    %cst_6 = arith.constant 9.99999982E-15 : f32
    %10 = vector.broadcast %cst_6 : f32 to vector<8x1xf32>
    %11 = arith.maximumf %9, %10 : vector<8x1xf32>
    %12 = math.rsqrt %11 : vector<8x1xf32>
    %13 = vector.broadcast %12 : vector<8x1xf32> to vector<8x128xf32>
    %14 = arith.mulf %6, %13 : vector<8x128xf32>
    %15 = arith.truncf %14 : vector<8x128xf32> to vector<8x128xbf16>
    %c0_7 = arith.constant 0 : index
    %c0_8 = arith.constant 0 : index
    %16 = vector.load %arg4[%c0_7, %c0_8] : memref<128x128xbf16, #tpu.memory_space<vmem>>, vector<128x128xbf16>
    %cst_9 = arith.constant dense<0.000000e+00> : vector<8x128xf32>
    %17 = tpu.matmul %15, %16, %cst_9 {dimension_numbers = #tpu.dot_dimension_numbers<[1], [1], [0], [0], [0, 0, 1, 0], [], []>} : vector<8x128xbf16>, vector<128x128xbf16>, vector<8x128xf32> -> vector<8x128xf32>
    %18 = arith.truncf %17 : vector<8x128xf32> to vector<8x128xbf16>
    %c0_10 = arith.constant 0 : index
    %c0_11 = arith.constant 0 : index
    %19 = vector.load %arg5[%c0_10, %c0_11] : memref<8x128xbf16, #tpu.memory_space<vmem>>, vector<8x128xbf16>
    tpu.vector_store %arg5[%c0_10, %c0_11], %18 {strides = array<i32>} : memref<8x128xbf16, #tpu.memory_space<vmem>>, vector<8x128xbf16>,
    return
  }
  func.func @transform_0(%arg0: i32) -> (i32, i32) {
    %c0_i32 = arith.constant 0 : i32
    %c0_i32_0 = arith.constant 0 : i32
    return %arg0, %c0_i32 : i32, i32
  }
  func.func @transform_1(%arg0: i32) -> (i32, i32) {
    %c0_i32 = arith.constant 0 : i32
    %c0_i32_0 = arith.constant 0 : i32
    %c0_i32_1 = arith.constant 0 : i32
    return %c0_i32, %c0_i32_0 : i32, i32
  }
  func.func @transform_2(%arg0: i32) -> (i32, i32) {
    %c0_i32 = arith.constant 0 : i32
    %c0_i32_0 = arith.constant 0 : i32
    %c0_i32_1 = arith.constant 0 : i32
    return %c0_i32, %c0_i32_0 : i32, i32
  }
  func.func @transform_3(%arg0: i32) -> (i32, i32) {
    %c0_i32 = arith.constant 0 : i32
    %c0_i32_0 = arith.constant 0 : i32
    %c0_i32_1 = arith.constant 0 : i32
    return %c0_i32, %c0_i32_0 : i32, i32
  }
  func.func @transform_4(%arg0: i32) -> (i32, i32) {
    %c0_i32 = arith.constant 0 : i32
    %c0_i32_0 = arith.constant 0 : i32
    return %arg0, %c0_i32 : i32, i32
  }
}

</mosaic_0001>

<bundles_post_ra>
// kernel: tpu_custom_call.1
= control target key start
LH: loop header
LB: loop body
LE: loop exit
PB: predicated region body
PF: predicated region fallthrough
CT: control target
= control target key end

     0   :  { %9 = vsyncpa [#allocation3], 0  ;;  %s797_s0 = inlined_call_operand.hbm [shape: f32[8,512], index: 0, kind: input, shape index: {}]   ;;  %s798_s1 = inlined_call_operand.hbm [shape: bf16[128,512], index: 1, kind: input, shape index: {}]   ;;  %s799_s2 = inlined_call_operand.vmem [shape: f32[1,128], index: 2, kind: input, shape index: {}]   ;;  %s800_s3 = inlined_call_operand.hbm [shape: bf16[128,128], index: 3, kind: input, shape index: {}]   ;;  %s801_s4 = inlined_call_operand.hbm [shape: bf16[8,128], index: 4, kind: output, shape index: {}]  }
   0x1   :  { %10 = vsyncpa [#allocation6], 0 }
   0x2   :  { %11 = vsyncpa [#allocation4], 0  ;;  %s711_s15 = smov [#allocation5]   ;;  %s617_s19 = scalar_lea.hbm %s798_s1, 4096 }
   0x3   :  { %s27_s16 = sshll.u32 %s711_s15, 4  ;;  %p618_p0 = scmp.ne.s32.totalorder %s798_s1, %s617_s19  ;;  %s28_s16 = int_to_ptr.vmem [resolvable:$true] %s27_s16 }
   0x4   :  { %p621_p1 = scmp.lt.u32.totalorder %s617_s19, %s798_s1 }
   0x6   :  { %p623_p2 = pnand %p621_p1, %p618_p0 }
   0x8   :  { %626 = shalt.err (!%p623_p2)
}
   0x9   :  { %s627_s24 = scalar_lea.vmem %s28_s16, 4096  ;;  %p632_p4 = scmp.lt.s32.totalorder %s28_s16, %s28_s16 }
   0xa   :  { %p628_p3 = scmp.ne.s32.totalorder %s28_s16, %s627_s24  ;;  %p633_p5 = scmp.lt.s32.totalorder %s627_s24, %s627_s24 }
   0xc   :  { %p634_p6 = por %p633_p5, %p632_p4 }
   0xe   :  { %p635_p7 = pnand %p634_p6, %p628_p3 }
  0x10   :  { %638 = shalt.err (!%p635_p7)
}
  0x11   :  { %s712_s25 = smov 256   ;;  %s713_s26 = smov 16  }
  0x12   :  { %33 = dma.hbm_to_vmem [thread:$0]  %s798_s1, 4096, %s28_s16, [#allocation6], %s712_s25, %s712_s25, %s713_s26  }
  0x13   :  { %s714_s29 = smov [#allocation2]   ;;  %s715_s5 = smov [#allocation7]  }
  0x14   :  { %s18_s30 = sshll.u32 %s714_s29, 4  ;;  %s41_s6 = sshll.u32 %s715_s5, 4  ;;  %s19_s30 = int_to_ptr.vmem [resolvable:$true] %s18_s30  ;;  %s42_s6 = int_to_ptr.vmem [resolvable:$true] %s41_s6 }
  0x15   :  { %s639_s9 = scalar_lea.hbm %s797_s0, 512 }
  0x16   :  { %p640_p8 = scmp.ne.s32.totalorder %s797_s0, %s639_s9  ;;  %p643_p9 = scmp.lt.u32.totalorder %s639_s9, %s797_s0 }
  0x18   :  { %p645_p10 = pnand %p643_p9, %p640_p8 }
  0x1a   :  { %648 = shalt.err (!%p645_p10)
}
  0x1b   :  { %s649_s1 = scalar_lea.vmem %s19_s30, 512  ;;  %p654_p12 = scmp.lt.s32.totalorder %s19_s30, %s19_s30 }
  0x1c   :  { %p650_p11 = scmp.ne.s32.totalorder %s19_s30, %s649_s1  ;;  %p655_p13 = scmp.lt.s32.totalorder %s649_s1, %s649_s1 }
  0x1e   :  { %p656_p0 = por %p655_p13, %p654_p12 }
  0x20   :  { %p657_p1 = pnand %p656_p0, %p650_p11 }
  0x22   :  { %660 = shalt.err (!%p657_p1)
}
  0x23   :  { %21 = dma.hbm_to_vmem [thread:$0]  %s797_s0, 512, %s19_s30, [#allocation3]  }
  0x24   :  { %s661_s18 = scalar_lea.hbm %s800_s3, 1024 }
  0x25   :  { %p662_p2 = scmp.ne.s32.totalorder %s800_s3, %s661_s18  ;;  %p665_p3 = scmp.lt.u32.totalorder %s661_s18, %s800_s3 }
  0x27   :  { %p667_p4 = pnand %p665_p3, %p662_p2 }
  0x29   :  { %670 = shalt.err (!%p667_p4)
}
  0x2a   :  { %s671_s23 = scalar_lea.vmem %s42_s6, 1024  ;;  %p676_p6 = scmp.lt.s32.totalorder %s42_s6, %s42_s6 }
  0x2b   :  { %p672_p5 = scmp.ne.s32.totalorder %s42_s6, %s671_s23  ;;  %p677_p7 = scmp.lt.s32.totalorder %s671_s23, %s671_s23 }
  0x2d   :  { %p678_p8 = por %p677_p7, %p676_p6 }
  0x2f   :  { %p679_p9 = pnand %p678_p8, %p672_p5 }
  0x31   :  { %682 = shalt.err (!%p679_p9)
}
  0x32   :  { %s716_s0 = smov 64   ;;  %s717_s24 = smov 4  }
  0x33   :  { %47 = dma.hbm_to_vmem [thread:$0]  %s800_s3, 1024, %s42_s6, [#allocation6], %s716_s0, %s716_s0, %s717_s24  }
  0x34   :  { %705 = dma.done.wait [#allocation3], 512  }
  0x35   :  { %706 = vsyncadd [#allocation3], 4294966784 }
  0x36   :  { %707 = dma.done.wait [#allocation6], 5120  }
  0x37   :  { %708 = vsyncadd [#allocation6], 4294962176  ;;  %v559_v0 = vld [vmem:[#allocation5 + $0x4] ss:$16 sps:$4 sm:$0xff]   ;;  %v561_v1 = vld [vmem:[#allocation5] ss:$16 sps:$4 sm:$0xff]  }
  0x38   :  { %265 = vmatprep.subr.bf16.mxu0 %v559_v0  ;;  %v562_v2 = vld [vmem:[#allocation5 + $0x24] ss:$16 sps:$4 sm:$0xff]   ;;  %v564_v3 = vld [vmem:[#allocation5 + $0x20] ss:$16 sps:$4 sm:$0xff]   ;;  %v59_v5 = vld [vmem:[#allocation2 + $0x8] sm:$0xff]  ;;  %v718_v41 = vmov 0.0  }
  0x39   :  { %266 = vmatpush1.bf16.xpose.msra.mxu0 %v561_v1  ;;  %v565_v4 = vld [vmem:[#allocation5 + $0x44] ss:$16 sps:$4 sm:$0xff]   ;;  %v63_v6 = vpack.c.bf16 %v59_v5, %v59_v5  ;;  %v567_v7 = vld [vmem:[#allocation5 + $0x40] ss:$16 sps:$4 sm:$0xff]   ;;  %v585_v18 = vld [vmem:[#allocation5 + $0xc] ss:$16 sps:$4 sm:$0xff]   ;;  %524 = vmatprep.subr.bf16.mxu1 %v718_v41 }
  0x3a   :  { %267 = vmatprep.subr.bf16.mxu0 %v562_v2  ;;  %v568_v8 = vld [vmem:[#allocation5 + $0x64] ss:$16 sps:$4 sm:$0xff]   ;;  %v570_v9 = vld [vmem:[#allocation5 + $0x60] ss:$16 sps:$4 sm:$0xff]   ;;  %v61_v20 = vld [vmem:[#allocation2 + $0x18] sm:$0xff]  ;;  %vm719_vm0 = vmmov 0  }
  0x3b   :  { %297 = vmatprep.mubr.bf16.mxu0 %v63_v6  ;;  %v571_v10 = vld [vmem:[#allocation5 + $0x84] ss:$16 sps:$4 sm:$0xff]   ;;  %v573_v11 = vld [vmem:[#allocation5 + $0x80] ss:$16 sps:$4 sm:$0xff]   ;;  %v583_v22 = vld [vmem:[#allocation5 + $0x8] ss:$16 sps:$4 sm:$0xff]   ;;  %v65_v23 = vpack.c.bf16 %v61_v20, %v61_v20  ;;  %540 = vmatprep.mubr.msk.bf16.mxu1 %vm719_vm0, %v718_v41 }
  0x3c   :  { %v574_v12 = vld [vmem:[#allocation5 + $0xa4] ss:$16 sps:$4 sm:$0xff]   ;;  %v576_v13 = vld [vmem:[#allocation5 + $0xa0] ss:$16 sps:$4 sm:$0xff]   ;;  %v588_v24 = vld [vmem:[#allocation5 + $0x2c] ss:$16 sps:$4 sm:$0xff]  }
  0x3d   :  { %v577_v14 = vld [vmem:[#allocation5 + $0xc4] ss:$16 sps:$4 sm:$0xff]   ;;  %v579_v15 = vld [vmem:[#allocation5 + $0xc0] ss:$16 sps:$4 sm:$0xff]   ;;  %v586_v25 = vld [vmem:[#allocation5 + $0x28] ss:$16 sps:$4 sm:$0xff]  }
  0x3e   :  { %v580_v16 = vld [vmem:[#allocation5 + $0xe4] ss:$16 sps:$4 sm:$0xff]   ;;  %v582_v17 = vld [vmem:[#allocation5 + $0xe0] ss:$16 sps:$4 sm:$0xff]   ;;  %v591_v26 = vld [vmem:[#allocation5 + $0x4c] ss:$16 sps:$4 sm:$0xff]  }
  0x3f   :  { %v58_v19 = vld [vmem:[#allocation2] sm:$0xff]  ;;  %v589_v27 = vld [vmem:[#allocation5 + $0x48] ss:$16 sps:$4 sm:$0xff]   ;;  %v594_v28 = vld [vmem:[#allocation5 + $0x6c] ss:$16 sps:$4 sm:$0xff]  }
  0x40   :  { %v62_v21 = vpack.c.bf16 %v58_v19, %v58_v19  ;;  %v592_v29 = vld [vmem:[#allocation5 + $0x68] ss:$16 sps:$4 sm:$0xff]   ;;  %v597_v30 = vld [vmem:[#allocation5 + $0x8c] ss:$16 sps:$4 sm:$0xff]   ;;  %v60_v38 = vld [vmem:[#allocation2 + $0x10] sm:$0xff] }
  0x41   :  { %268 = vmatpush1.bf16.xpose.msra.mxu0 %v564_v3  ;;  %v595_v31 = vld [vmem:[#allocation5 + $0x88] ss:$16 sps:$4 sm:$0xff]   ;;  %v600_v32 = vld [vmem:[#allocation5 + $0xac] ss:$16 sps:$4 sm:$0xff]   ;;  %v64_v39 = vpack.c.bf16 %v60_v38, %v60_v38  ;;  %v607_v40 = vld [vmem:[#allocation7] sm:$0xff]  }
  0x42   :  { %269 = vmatprep.subr.bf16.mxu0 %v565_v4  ;;  %v598_v33 = vld [vmem:[#allocation5 + $0xa8] ss:$16 sps:$4 sm:$0xff]   ;;  %v603_v34 = vld [vmem:[#allocation5 + $0xcc] ss:$16 sps:$4 sm:$0xff]   ;;  %525 = vmatpush3.bf16.xpose.msra.mxu1 %v607_v40  ;;  %v609_v43 = vld [vmem:[#allocation7 + $0x10] sm:$0xff]  }
  0x43   :  { %v601_v35 = vld [vmem:[#allocation5 + $0xc8] ss:$16 sps:$4 sm:$0xff]   ;;  %v606_v36 = vld [vmem:[#allocation5 + $0xec] ss:$16 sps:$4 sm:$0xff]   ;;  %526 = vmatprep.subr.bf16.mxu1 %v718_v41  ;;  %v611_v45 = vld [vmem:[#allocation7 + $0x20] sm:$0xff]  }
  0x44   :  { %v604_v37 = vld [vmem:[#allocation5 + $0xe8] ss:$16 sps:$4 sm:$0xff]   ;;  %v474_v47 = vld [vmem:[%s799_s2] ss:$0 sm:$0xff]  ;;  %v613_v54 = vld [vmem:[#allocation7 + $0x30] sm:$0xff]   ;;  %s720_s2 = smov [#allocation8]  }
  0x45   :  { %v608_v42 = vld [vmem:[#allocation7 + $0x8] sm:$0xff]   ;;  %v610_v44 = vld [vmem:[#allocation7 + $0x18] sm:$0xff]   ;;  %s464_s28 = sshll.u32 %s720_s2, 4  ;;  %s465_s28 = int_to_ptr.vmem [resolvable:$true] %s464_s28 }
  0x46   :  { %v612_v46 = vld [vmem:[#allocation7 + $0x28] sm:$0xff]   ;;  %v614_v55 = vld [vmem:[#allocation7 + $0x38] sm:$0xff]   ;;  %s683_s29 = scalar_lea.vmem %s465_s28, 64  ;;  %p688_p11 = scmp.lt.s32.totalorder %s465_s28, %s465_s28 }
  0x47   :  { %p684_p10 = scmp.ne.s32.totalorder %s465_s28, %s683_s29  ;;  %p689_p12 = scmp.lt.s32.totalorder %s683_s29, %s683_s29 }
  0x49   :  { %270 = vmatpush1.bf16.xpose.msra.mxu0 %v567_v7  ;;  %p690_p13 = por %p689_p12, %p688_p11 }
  0x4a   :  { %271 = vmatprep.subr.bf16.mxu0 %v568_v8  ;;  %527 = vmatpush3.bf16.xpose.msra.mxu1 %v608_v42 }
  0x4b   :  { %528 = vmatprep.subr.bf16.mxu1 %v718_v41  ;;  %p691_p0 = pnand %p690_p13, %p684_p10 }
  0x51   :  { %272 = vmatpush1.bf16.xpose.msra.mxu0 %v570_v9 }
  0x52   :  { %273 = vmatprep.subr.bf16.mxu0 %v571_v10  ;;  %529 = vmatpush3.bf16.xpose.msra.mxu1 %v609_v43 }
  0x53   :  { %530 = vmatprep.subr.bf16.mxu1 %v718_v41 }
  0x59   :  { %274 = vmatpush1.bf16.xpose.msra.mxu0 %v573_v11 }
  0x5a   :  { %275 = vmatprep.subr.bf16.mxu0 %v574_v12  ;;  %531 = vmatpush3.bf16.xpose.msra.mxu1 %v610_v44 }
  0x5b   :  { %532 = vmatprep.subr.bf16.mxu1 %v718_v41 }
  0x61   :  { %276 = vmatpush1.bf16.xpose.msra.mxu0 %v576_v13 }
  0x62   :  { %277 = vmatprep.subr.bf16.mxu0 %v577_v14  ;;  %533 = vmatpush3.bf16.xpose.msra.mxu1 %v611_v45 }
  0x63   :  { %534 = vmatprep.subr.bf16.mxu1 %v718_v41 }
  0x69   :  { %278 = vmatpush1.bf16.xpose.msra.mxu0 %v579_v15 }
  0x6a   :  { %279 = vmatprep.subr.bf16.mxu0 %v580_v16  ;;  %535 = vmatpush3.bf16.xpose.msra.mxu1 %v612_v46 }
  0x6b   :  { %536 = vmatprep.subr.bf16.mxu1 %v718_v41 }
  0x71   :  { %280 = vmatpush1.bf16.xpose.msra.mxu0 %v582_v17 }
  0x72   :  { %305 = vmatprep.subr.bf16.mxu0 %v585_v18  ;;  %537 = vmatpush3.bf16.xpose.msra.mxu1 %v613_v54 }
  0x73   :  { %538 = vmatprep.subr.bf16.mxu1 %v718_v41 }
  0x78   :  { %298 = vmatmul.mubr.bf16.vlgmr.msra.gmra.mrb[0].mxu0 %v62_v21 }
  0x79   :  { %306 = vmatpush1.bf16.xpose.msra.mxu0 %v583_v22  ;;  %337 = vmatprep.mubr.bf16.mxu0 %v65_v23 }
  0x7a   :  { %307 = vmatprep.subr.bf16.mxu0 %v588_v24  ;;  %539 = vmatpush3.bf16.xpose.msra.mxu1 %v614_v55 }
  0x81   :  { %308 = vmatpush1.bf16.xpose.msra.mxu0 %v586_v25 }
  0x82   :  { %309 = vmatprep.subr.bf16.mxu0 %v591_v26 }
  0x89   :  { %310 = vmatpush1.bf16.xpose.msra.mxu0 %v589_v27 }
  0x8a   :  { %311 = vmatprep.subr.bf16.mxu0 %v594_v28 }
  0x91   :  { %312 = vmatpush1.bf16.xpose.msra.mxu0 %v592_v29 }
  0x92   :  { %313 = vmatprep.subr.bf16.mxu0 %v597_v30 }
  0x99   :  { %314 = vmatpush1.bf16.xpose.msra.mxu0 %v595_v31 }
  0x9a   :  { %315 = vmatprep.subr.bf16.mxu0 %v600_v32 }
  0xa1   :  { %316 = vmatpush1.bf16.xpose.msra.mxu0 %v598_v33 }
  0xa2   :  { %317 = vmatprep.subr.bf16.mxu0 %v603_v34 }
  0xa9   :  { %318 = vmatpush1.bf16.xpose.msra.mxu0 %v601_v35 }
  0xaa   :  { %319 = vmatprep.subr.bf16.mxu0 %v606_v36 }
  0xb1   :  { %320 = vmatpush1.bf16.xpose.msra.mxu0 %v604_v37 }
  0xb8   :  { %338 = vmatmul.mubr.bf16.vlgmr.msra.gmra.mrb[0].mxu0 %v64_v39 }
 0x18b   :  { %v339_v48 = vpop.f32.mrb[0].mxu0 }
 0x18c   :  { %v544_v49 = vadd.f32 %v474_v47, %v339_v48  ;;  %v341_v50 = vpop.f32.mrb[1].mxu0 }
 0x18d   :  { %v342_v51 = vpop.f32.mrb[2].mxu0 }
 0x18e   :  { %v343_v52 = vpop.f32.mrb[3].mxu0  ;;  %v345_v53 = vmul.f32 %v544_v49, %v544_v49 }
 0x190   :  { %346 = vadd.xlane.f32.xlu0 %v345_v53 }
 0x21d   :  { %v347_v56 = vpop.xlane.xlu0 %346 }
 0x21e   :  { %v348_v57 = vmax.f32 %v347_v56, 1e-14 }
 0x220   :  { %615 = vrsqrt.f32 %v348_v57 }
 0x22a   :  { %v616_v58 = vpop.eup %615 }
 0x22b   :  { %v350_v59 = vmul.f32 %v616_v58, %v544_v49 }
 0x22d   :  { %v351_v60 = vpack.c.bf16 %v350_v59, %v350_v59 }
 0x22f   :  { %541 = vmatmul.mubr.bf16.vlgmr.msra.gmra.mrb[0].mxu1 %v351_v60 }
 0x302   :  { %v450_v61 = vpop.f32.mrb[0].mxu1 }
 0x303   :  { %v456_v62 = vpack.c.bf16 %v450_v61, %v450_v61  ;;  %v542_v63 = vpop.f32.mrb[1].mxu1 }
 0x304   :  { %v453_v0 = vpop.f32.mrb[2].mxu1 }
 0x305   :  { %457 = vst [vmem:[#allocation8] sm:$0xf] %v456_v62  ;;  %v543_v1 = vpop.f32.mrb[3].mxu1 }
 0x306   :  { %694 = shalt.err (!%p691_p0)
}
 0x307   :  { %s695_s6 = scalar_lea.hbm %s801_s4, 64 }
 0x308   :  { %p696_p1 = scmp.ne.s32.totalorder %s801_s4, %s695_s6  ;;  %p699_p2 = scmp.lt.u32.totalorder %s695_s6, %s801_s4 }
 0x30a   :  { %p701_p3 = pnand %p699_p2, %p696_p1 }
 0x30c   :  { %704 = shalt.err (!%p701_p3)
}
 0x30d   :  { %467 = dma.vmem_to_hbm [thread:$0]  %s465_s28, 64, %s801_s4, [#allocation4]  }
 0x30e   :  { %709 = dma.done.wait [#allocation4], 64  }
 0x30f   :  { %710 = vsyncadd [#allocation4], 4294967232 }
 0x310   :  { %471 = vsyncpa [#allocation3], 1 }
 0x311   :  { %472 = vsyncpa [#allocation6], 1 }
 0x312   :  { %473 = vsyncpa [#allocation4], 1 }

</bundles_post_ra>
